<compile_context>
chip_gen: v5e
topology: v5e:2x2
jax: 0.10.0
libtpu: 0.0.40
codegen_flags: <defaults>
</compile_context>

<pallas_src>
from typing import NamedTuple

import jax
import jax.numpy as jnp
from jax.experimental import pallas as pl
from jax.experimental.pallas import tpu as pltpu

LANE = 128  # lane width: padding target for every last dim


def _round_up(n, m):
    return (n + m - 1) // m * m


def fcl_kernel(x_ref, w1_ref, b1_ref, w2_ref, b2_ref, o_ref):
    """One batch tile of o = relu(x @ w1t + b1) @ w2t + b2.

    x_ref : [TB, Kp] (mxu dtype)   w1_ref: [Kp, Hp] (mxu dtype)   b1_ref: [1, Hp] f32
    w2_ref: [Hp, Np] (mxu dtype)   b2_ref: [1, Np] f32            o_ref : [TB, Np]
    Weights were transposed / padded / cast once in the wrapper, so both matmuls
    are plain MXU [M,K]@[K,N] with f32 accumulation; bias-add and ReLU stay f32.
    """
    h = jnp.dot(x_ref[...], w1_ref[...], preferred_element_type=jnp.float32)
    h = jnp.maximum(h + b1_ref[...], 0.0)                       # f32 epilogue (VPU)
    y = jnp.dot(h.astype(w2_ref.dtype), w2_ref[...],
                preferred_element_type=jnp.float32)
    o_ref[...] = (y + b2_ref[...]).astype(o_ref.dtype)


class FCLParams(NamedTuple):
    w1t: jax.Array   # [Kp, Hp] = pad(w1.T), mxu dtype
    b1p: jax.Array   # [1, Hp]  f32
    w2t: jax.Array   # [Hp, Np] = pad(w2.T), mxu dtype
    b2p: jax.Array   # [1, Np]  f32
    x_dim: int
    h_dim: int
    y_dim: int


def preprocess_params(w1, b1, w2, b2, *, mxu_dtype=None):
    """One-time weight prep (hoist to module init in real use): transpose to
    [in, out], zero-pad every dim to a multiple of 128 (lane-dense), and cast the
    matmul operands to `mxu_dtype`. Biases stay f32 for the f32 epilogue."""
    h_dim, x_dim = w1.shape
    y_dim = w2.shape[0]
    if mxu_dtype is None:
        mxu_dtype = w1.dtype
    kp = _round_up(x_dim, LANE)
    hp = _round_up(h_dim, LANE)
    np_ = _round_up(y_dim, LANE)
    w1t = jnp.zeros((kp, hp), mxu_dtype).at[:x_dim, :h_dim].set(w1.T.astype(mxu_dtype))
    w2t = jnp.zeros((hp, np_), mxu_dtype).at[:h_dim, :y_dim].set(w2.T.astype(mxu_dtype))
    b1p = jnp.zeros((1, hp), jnp.float32).at[0, :h_dim].set(b1.astype(jnp.float32))
    b2p = jnp.zeros((1, np_), jnp.float32).at[0, :y_dim].set(b2.astype(jnp.float32))
    return FCLParams(w1t, b1p, w2t, b2p, x_dim, h_dim, y_dim)


def _pick_batch_tile(B, *, preferred=512, mult=8, min_steps=4):
    """Largest batch tile <= `preferred` (multiple of `mult`, dividing B) that
    still leaves >= `min_steps` grid steps when possible, so each v7x TensorCore
    keeps >= 2 pipelined steps after megacore sharding."""
    cands = [t for t in range(mult, min(preferred, B) + 1, mult) if B % t == 0]
    if not cands:
        return B  # tiny / ragged batch: a single full-extent block is always legal
    for t in sorted(cands, reverse=True):
        if B // t >= min_steps:
            return t
    return max(cands)


def _resident_spec(shape, single_buffer):
    """BlockSpec for an operand whose block index never changes (VMEM-resident)."""
    if single_buffer:
        # Don't double-buffer weights/biases that are never re-fetched.
        return pl.BlockSpec(shape, lambda i: (0, 0), pipeline_mode=pl.Buffered(1))
    return pl.BlockSpec(shape, lambda i: (0, 0))


def _build_call(B, tb, kp, hp, np_, mxu_dtype, out_dtype, single_buffer):
    itm = jnp.dtype(mxu_dtype).itemsize
    otm = jnp.dtype(out_dtype).itemsize
    # VMEM budget: resident weights (x2 safety even if single-buffered) + biases
    # + double-buffered x / out tiles + f32 intermediates, 2x headroom, clamped to
    # [32 MiB, 64 MiB] so the same budget fits v7x's 64 MiB physical VMEM.
    est = (2 * (kp * hp + hp * np_) * itm
           + 2 * (hp + np_) * 4
           + 2 * tb * kp * itm
           + 2 * tb * np_ * otm
           + tb * hp * 4 + tb * np_ * 4)
    vmem_limit = int(min(max(2 * est, 32 * 1024 * 1024), 64 * 1024 * 1024))

    return pl.pallas_call(
        fcl_kernel,
        out_shape=jax.ShapeDtypeStruct((B, np_), out_dtype),
        grid_spec=pltpu.PrefetchScalarGridSpec(
            num_scalar_prefetch=0,
            grid=(pl.cdiv(B, tb),),
            in_specs=[
                # Activations stream per batch tile (software-pipelined DMA).
                pl.BlockSpec((tb, kp), lambda i: (i, 0)),
                # Weights / biases: constant index -> stay VMEM-resident.
                _resident_spec((kp, hp), single_buffer),
                _resident_spec((1, hp), single_buffer),
                _resident_spec((hp, np_), single_buffer),
                _resident_spec((1, np_), single_buffer),
            ],
            # Lane-dense output: last dim is a multiple of 128 -> unmasked vst.
            out_specs=pl.BlockSpec((tb, np_), lambda i: (i, 0)),
        ),
        compiler_params=pltpu.CompilerParams(
            dimension_semantics=("parallel",),  # batch tiles shard across TCs (v7x)
            vmem_limit_bytes=vmem_limit,
        ),
    )


def fcl_forward(x, params: FCLParams, *, tb_batch=None):
    """x: [B, x_dim] -> [B, y_dim] using preprocessed (padded/transposed) params."""
    B, x_dim = x.shape
    assert x_dim == params.x_dim, (x_dim, params.x_dim)
    kp, hp = params.w1t.shape
    np_ = params.w2t.shape[1]
    mxu_dtype = params.w1t.dtype
    out_dtype = x.dtype

    if tb_batch is None:
        mult = 16 if mxu_dtype == jnp.bfloat16 else 8
        tb_batch = _pick_batch_tile(B, preferred=512, mult=mult)

    xp = x.astype(mxu_dtype)
    if kp != x_dim:
        xp = jnp.pad(xp, ((0, 0), (0, kp - x_dim)))  # zero-pad K: lane-dense loads

    args = (xp, params.w1t, params.b1p, params.w2t, params.b2p)
    try:
        out = _build_call(B, tb_batch, kp, hp, np_, mxu_dtype, out_dtype, True)(*args)
    except Exception:
        # Fallback for JAX builds that reject pipeline_mode=pl.Buffered(1) on a
        # constant-index BlockSpec (only costs the extra resident-weight buffer).
        out = _build_call(B, tb_batch, kp, hp, np_, mxu_dtype, out_dtype, False)(*args)
    return out[:, :params.y_dim]


def fcl_apply(x, w1, b1, w2, b2, *, mxu_dtype=None, tb_batch=None):
    """Convenience path taking raw PyTorch-layout params; prefer preprocessing once."""
    return fcl_forward(x, preprocess_params(w1, b1, w2, b2, mxu_dtype=mxu_dtype),
                       tb_batch=tb_batch)


def _kaiming_normal(key, out_features, in_features, dtype=jnp.float32):
    # nn.init.kaiming_normal_ default: fan_in mode, gain = sqrt(2).
    std = (2.0 / in_features) ** 0.5
    return (jax.random.normal(key, (out_features, in_features)) * std).astype(dtype)


if __name__ == "__main__":
    # Small shapes consistent with the module: x_dim=32, h_dim=64, y_dim=16, B=64.
    B, x_dim, h_dim, y_dim = 64, 32, 64, 16
    key = jax.random.PRNGKey(0)
    k_x, k_w1, k_w2 = jax.random.split(key, 3)

    x = jax.random.normal(k_x, (B, x_dim), dtype=jnp.float32)
    w1 = _kaiming_normal(k_w1, h_dim, x_dim)        # lin_1.weight: [h_dim, x_dim]
    b1 = jnp.zeros((h_dim,), jnp.float32)           # lin_1.bias
    w2 = _kaiming_normal(k_w2, y_dim, h_dim)        # lin_2.weight: [y_dim, h_dim]
    b2 = jnp.zeros((y_dim,), jnp.float32)           # lin_2.bias

    # Pure-JAX reference (same math as the PyTorch forward).
    ref = jnp.maximum(x @ w1.T + b1, 0.0) @ w2.T + b2

    # Exact path: f32 MXU operands -> module semantics preserved.
    params = preprocess_params(w1, b1, w2, b2)      # one-time prep (== module init)
    out = fcl_forward(x, params)
    jax.block_until_ready(out)
    assert out.shape == (B, y_dim)
    assert jnp.allclose(out, ref, atol=2e-5, rtol=2e-5), \
        float(jnp.max(jnp.abs(out - ref)))

    # Fast path for v6e/v7x: bf16 MXU operands, f32 accumulation / bias / ReLU.
    params_bf16 = preprocess_params(w1, b1, w2, b2, mxu_dtype=jnp.bfloat16)
    out_bf16 = fcl_forward(x, params_bf16)
    jax.block_until_ready(out_bf16)
    assert out_bf16.shape == (B, y_dim)
    assert jnp.allclose(out_bf16, ref, atol=5e-2, rtol=5e-2)

    print("KERNEL_OK")
</pallas_src>

<mosaic_0001>
module attributes {stable_mosaic.version = 11 : i64} {
  func.func @fcl_kernel(%arg0: i32, %arg1: memref<16x128xf32, #tpu.memory_space<vmem>>, %arg2: memref<128x128xf32, #tpu.memory_space<vmem>>, %arg3: memref<1x128xf32, #tpu.memory_space<vmem>>, %arg4: memref<128x128xf32, #tpu.memory_space<vmem>>, %arg5: memref<1x128xf32, #tpu.memory_space<vmem>>, %arg6: memref<16x128xf32, #tpu.memory_space<vmem>>) attributes {dimension_semantics = [#tpu.dimension_semantics<parallel>], iteration_bounds = array<i64: 4>, scalar_prefetch = 0 : i64, scratch_operands = 0 : i64, tpu.core_type = #tpu.core_type<tc>, window_params = [{transform_indices = @transform_0, window_bounds = array<i64: 16, 128>}, {pipeline_mode = #tpu.pipeline_mode<synchronous>, transform_indices = @transform_1, window_bounds = array<i64: 128, 128>}, {pipeline_mode = #tpu.pipeline_mode<synchronous>, transform_indices = @transform_2, window_bounds = array<i64: 1, 128>}, {pipeline_mode = #tpu.pipeline_mode<synchronous>, transform_indices = @transform_3, window_bounds = array<i64: 128, 128>}, {pipeline_mode = #tpu.pipeline_mode<synchronous>, transform_indices = @transform_4, window_bounds = array<i64: 1, 128>}, {transform_indices = @transform_5, window_bounds = array<i64: 16, 128>}]} {
    %c0 = arith.constant 0 : index
    %c0_0 = arith.constant 0 : index
    %0 = vector.load %arg1[%c0, %c0_0] : memref<16x128xf32, #tpu.memory_space<vmem>>, vector<16x128xf32>
    %c0_1 = arith.constant 0 : index
    %c0_2 = arith.constant 0 : index
    %1 = vector.load %arg2[%c0_1, %c0_2] : memref<128x128xf32, #tpu.memory_space<vmem>>, vector<128x128xf32>
    %cst = arith.constant dense<0.000000e+00> : vector<16x128xf32>
    %2 = tpu.matmul %0, %1, %cst {dimension_numbers = #tpu.dot_dimension_numbers<[1], [0], [0], [1], [0, 0, 1, 1], [], []>} : vector<16x128xf32>, vector<128x128xf32>, vector<16x128xf32> -> vector<16x128xf32>
    %c0_3 = arith.constant 0 : index
    %c0_4 = arith.constant 0 : index
    %3 = vector.load %arg3[%c0_3, %c0_4] : memref<1x128xf32, #tpu.memory_space<vmem>>, vector<1x128xf32>
    %4 = vector.broadcast %3 : vector<1x128xf32> to vector<16x128xf32>
    %5 = arith.addf %2, %4 : vector<16x128xf32>
    %cst_5 = arith.constant 0.000000e+00 : f32
    %6 = vector.broadcast %cst_5 : f32 to vector<16x128xf32>
    %7 = arith.maximumf %5, %6 : vector<16x128xf32>
    %c0_6 = arith.constant 0 : index
    %c0_7 = arith.constant 0 : index
    %8 = vector.load %arg4[%c0_6, %c0_7] : memref<128x128xf32, #tpu.memory_space<vmem>>, vector<128x128xf32>
    %cst_8 = arith.constant dense<0.000000e+00> : vector<16x128xf32>
    %9 = tpu.matmul %7, %8, %cst_8 {dimension_numbers = #tpu.dot_dimension_numbers<[1], [0], [0], [1], [0, 0, 1, 1], [], []>} : vector<16x128xf32>, vector<128x128xf32>, vector<16x128xf32> -> vector<16x128xf32>
    %c0_9 = arith.constant 0 : index
    %c0_10 = arith.constant 0 : index
    %10 = vector.load %arg5[%c0_9, %c0_10] : memref<1x128xf32, #tpu.memory_space<vmem>>, vector<1x128xf32>
    %11 = vector.broadcast %10 : vector<1x128xf32> to vector<16x128xf32>
    %12 = arith.addf %9, %11 : vector<16x128xf32>
    %c0_11 = arith.constant 0 : index
    %c0_12 = arith.constant 0 : index
    %13 = vector.load %arg6[%c0_11, %c0_12] : memref<16x128xf32, #tpu.memory_space<vmem>>, vector<16x128xf32>
    tpu.vector_store %arg6[%c0_11, %c0_12], %12 {strides = array<i32>} : memref<16x128xf32, #tpu.memory_space<vmem>>, vector<16x128xf32>,
    return
  }
  func.func @transform_0(%arg0: i32) -> (i32, i32) {
    %c0_i32 = arith.constant 0 : i32
    %c0_i32_0 = arith.constant 0 : i32
    return %arg0, %c0_i32 : i32, i32
  }
  func.func @transform_1(%arg0: i32) -> (i32, i32) {
    %c0_i32 = arith.constant 0 : i32
    %c0_i32_0 = arith.constant 0 : i32
    %c0_i32_1 = arith.constant 0 : i32
    return %c0_i32, %c0_i32_0 : i32, i32
  }
  func.func @transform_2(%arg0: i32) -> (i32, i32) {
    %c0_i32 = arith.constant 0 : i32
    %c0_i32_0 = arith.constant 0 : i32
    %c0_i32_1 = arith.constant 0 : i32
    return %c0_i32, %c0_i32_0 : i32, i32
  }
  func.func @transform_3(%arg0: i32) -> (i32, i32) {
    %c0_i32 = arith.constant 0 : i32
    %c0_i32_0 = arith.constant 0 : i32
    %c0_i32_1 = arith.constant 0 : i32
    return %c0_i32, %c0_i32_0 : i32, i32
  }
  func.func @transform_4(%arg0: i32) -> (i32, i32) {
    %c0_i32 = arith.constant 0 : i32
    %c0_i32_0 = arith.constant 0 : i32
    %c0_i32_1 = arith.constant 0 : i32
    return %c0_i32, %c0_i32_0 : i32, i32
  }
  func.func @transform_5(%arg0: i32) -> (i32, i32) {
    %c0_i32 = arith.constant 0 : i32
    %c0_i32_0 = arith.constant 0 : i32
    return %arg0, %c0_i32 : i32, i32
  }
}

module attributes {stable_mosaic.version = 11 : i64} {
  func.func @fcl_kernel(%arg0: i32, %arg1: memref<16x128xf32, #tpu.memory_space<vmem>>, %arg2: memref<128x128xf32, #tpu.memory_space<vmem>>, %arg3: memref<1x128xf32, #tpu.memory_space<vmem>>, %arg4: memref<128x128xf32, #tpu.memory_space<vmem>>, %arg5: memref<1x128xf32, #tpu.memory_space<vmem>>, %arg6: memref<16x128xf32, #tpu.memory_space<vmem>>) attributes {dimension_semantics = [#tpu.dimension_semantics<parallel>], iteration_bounds = array<i64: 4>, scalar_prefetch = 0 : i64, scratch_operands = 0 : i64, tpu.core_type = #tpu.core_type<tc>, window_params = [{transform_indices = @transform_0, window_bounds = array<i64: 16, 128>}, {pipeline_mode = #tpu.pipeline_mode<synchronous>, transform_indices = @transform_1, window_bounds = array<i64: 128, 128>}, {pipeline_mode = #tpu.pipeline_mode<synchronous>, transform_indices = @transform_2, window_bounds = array<i64: 1, 128>}, {pipeline_mode = #tpu.pipeline_mode<synchronous>, transform_indices = @transform_3, window_bounds = array<i64: 128, 128>}, {pipeline_mode = #tpu.pipeline_mode<synchronous>, transform_indices = @transform_4, window_bounds = array<i64: 1, 128>}, {transform_indices = @transform_5, window_bounds = array<i64: 16, 128>}]} {
    %c0 = arith.constant 0 : index
    %c0_0 = arith.constant 0 : index
    %0 = vector.load %arg1[%c0, %c0_0] : memref<16x128xf32, #tpu.memory_space<vmem>>, vector<16x128xf32>
    %c0_1 = arith.constant 0 : index
    %c0_2 = arith.constant 0 : index
    %1 = vector.load %arg2[%c0_1, %c0_2] : memref<128x128xf32, #tpu.memory_space<vmem>>, vector<128x128xf32>
    %cst = arith.constant dense<0.000000e+00> : vector<16x128xf32>
    %2 = tpu.matmul %0, %1, %cst {dimension_numbers = #tpu.dot_dimension_numbers<[1], [0], [0], [1], [0, 0, 1, 1], [], []>} : vector<16x128xf32>, vector<128x128xf32>, vector<16x128xf32> -> vector<16x128xf32>
    %c0_3 = arith.constant 0 : index
    %c0_4 = arith.constant 0 : index
    %3 = vector.load %arg3[%c0_3, %c0_4] : memref<1x128xf32, #tpu.memory_space<vmem>>, vector<1x128xf32>
    %4 = vector.broadcast %3 : vector<1x128xf32> to vector<16x128xf32>
    %5 = arith.addf %2, %4 : vector<16x128xf32>
    %cst_5 = arith.constant 0.000000e+00 : f32
    %6 = vector.broadcast %cst_5 : f32 to vector<16x128xf32>
    %7 = arith.maximumf %5, %6 : vector<16x128xf32>
    %c0_6 = arith.constant 0 : index
    %c0_7 = arith.constant 0 : index
    %8 = vector.load %arg4[%c0_6, %c0_7] : memref<128x128xf32, #tpu.memory_space<vmem>>, vector<128x128xf32>
    %cst_8 = arith.constant dense<0.000000e+00> : vector<16x128xf32>
    %9 = tpu.matmul %7, %8, %cst_8 {dimension_numbers = #tpu.dot_dimension_numbers<[1], [0], [0], [1], [0, 0, 1, 1], [], []>} : vector<16x128xf32>, vector<128x128xf32>, vector<16x128xf32> -> vector<16x128xf32>
    %c0_9 = arith.constant 0 : index
    %c0_10 = arith.constant 0 : index
    %10 = vector.load %arg5[%c0_9, %c0_10] : memref<1x128xf32, #tpu.memory_space<vmem>>, vector<1x128xf32>
    %11 = vector.broadcast %10 : vector<1x128xf32> to vector<16x128xf32>
    %12 = arith.addf %9, %11 : vector<16x128xf32>
    %c0_11 = arith.constant 0 : index
    %c0_12 = arith.constant 0 : index
    %13 = vector.load %arg6[%c0_11, %c0_12] : memref<16x128xf32, #tpu.memory_space<vmem>>, vector<16x128xf32>
    tpu.vector_store %arg6[%c0_11, %c0_12], %12 {strides = array<i32>} : memref<16x128xf32, #tpu.memory_space<vmem>>, vector<16x128xf32>,
    return
  }
  func.func @transform_0(%arg0: i32) -> (i32, i32) {
    %c0_i32 = arith.constant 0 : i32
    %c0_i32_0 = arith.constant 0 : i32
    return %arg0, %c0_i32 : i32, i32
  }
  func.func @transform_1(%arg0: i32) -> (i32, i32) {
    %c0_i32 = arith.constant 0 : i32
    %c0_i32_0 = arith.constant 0 : i32
    %c0_i32_1 = arith.constant 0 : i32
    return %c0_i32, %c0_i32_0 : i32, i32
  }
  func.func @transform_2(%arg0: i32) -> (i32, i32) {
    %c0_i32 = arith.constant 0 : i32
    %c0_i32_0 = arith.constant 0 : i32
    %c0_i32_1 = arith.constant 0 : i32
    return %c0_i32, %c0_i32_0 : i32, i32
  }
  func.func @transform_3(%arg0: i32) -> (i32, i32) {
    %c0_i32 = arith.constant 0 : i32
    %c0_i32_0 = arith.constant 0 : i32
    %c0_i32_1 = arith.constant 0 : i32
    return %c0_i32, %c0_i32_0 : i32, i32
  }
  func.func @transform_4(%arg0: i32) -> (i32, i32) {
    %c0_i32 = arith.constant 0 : i32
    %c0_i32_0 = arith.constant 0 : i32
    %c0_i32_1 = arith.constant 0 : i32
    return %c0_i32, %c0_i32_0 : i32, i32
  }
  func.func @transform_5(%arg0: i32) -> (i32, i32) {
    %c0_i32 = arith.constant 0 : i32
    %c0_i32_0 = arith.constant 0 : i32
    return %arg0, %c0_i32 : i32, i32
  }
}

</mosaic_0001>

<bundles_post_ra>
// kernel: tpu_custom_call.1
= control target key start
LH: loop header
LB: loop body
LE: loop exit
PB: predicated region body
PF: predicated region fallthrough
CT: control target
= control target key end

     0   :  { %10 = vsyncpa [#allocation3], 0  ;;  %s965_s0 = inlined_call_operand.hbm [shape: f32[64,128], index: 0, kind: input, shape index: {}]   ;;  %s966_s1 = inlined_call_operand.hbm [shape: f32[128,128], index: 1, kind: input, shape index: {}]   ;;  %s967_s2 = inlined_call_operand.vmem [shape: f32[1,128], index: 2, kind: input, shape index: {}]   ;;  %s968_s3 = inlined_call_operand.hbm [shape: f32[128,128], index: 3, kind: input, shape index: {}]   ;;  %s969_s4 = inlined_call_operand.vmem [shape: f32[1,128], index: 4, kind: input, shape index: {}]   ;;  %s970_s5 = inlined_call_operand.hbm [shape: f32[64,128], index: 5, kind: output, shape index: {}]  }
   0x1   :  { %12 = vsyncpa [#allocation3 + $0x1], 0 }
   0x2   :  { %13 = vsyncpa [#allocation6], 0 }
   0x3   :  { %14 = vsyncpa [#allocation4], 0 }
   0x4   :  { %16 = vsyncpa [#allocation4 + $0x1], 0  ;;  %s803_s18 = smov 0   ;;  %s805_s19 = smov 0  }
   0x5   :  { %s807_s20 = smov 0   ;;  %s809_s21 = smov 0  }
   0x6 LB: > { %s824_s22 = sadd.s32 4294967295, %s765_s21   ;;  %s480_s23 = sadd.s32 4294967294, %s765_s21   ;;  %s765_s21 = sphi %s809_s21, %s981_s21   ;;  %s761_s20 = sphi %s807_s20, %s980_s20   ;;  %s757_s19 = sphi %s805_s19, %s979_s19   ;;  %s753_s18 = sphi %s803_s18, %s978_s18  }
   0x7   : > { %p42_p0 = scmp.ne.s32.totalorder %s757_s19, %s753_s18  ;;  %p43_p1 = scmp.eq.s32.totalorder %s824_s22, 0 }
   0x8   : > { %p150_p2 = scmp.eq.s32.totalorder %s824_s22, 3  ;;  %p156_p3 = scmp.eq.s32.totalorder %s480_s23, 3 }
   0x9   : > { %p833_p4 = por %p43_p1, %p42_p0  ;;  %p481_p5 = scmp.ge.s32.totalorder %s765_s21, 1 }
   0xa   : > { %p838_p6 = por %p156_p3, %p42_p0  ;;  %p163_p7 = scmp.lt.s32.totalorder %s765_s21, 5 }
   0xb   : > { %s174_s28 = sshll.u32 %s966_s1, 4  ;;  %s767_s30 = smov [#allocation5]   ;;  %s175_s28 = int_to_ptr.hbm [resolvable:$true] %s174_s28 }
   0xc   : > { %p846_p8 = pnand %p481_p5, %p163_p7  ;;  %s176_s6 = sshll.u32 %s767_s30, 4  ;;  %s177_s6 = int_to_ptr.vmem [resolvable:$true] %s176_s6 }
   0xd   : > { %s191_s9 = sshll.u32 %s968_s3, 4  ;;  %s971_s10 = smov 128   ;;  %s192_s9 = int_to_ptr.hbm [resolvable:$true] %s191_s9 }
   0xe   : > { %p544_p9 = pneg %p846_p8  ;;  %s769_s11 = smov 8  }
   0xf   : > { %s770_s12 = smov [#allocation7]   ;;  %s864_s14 = sadd.s32 1, %s765_s21  }
  0x10   : > { %p545_p10 = pnand %p544_p9, %p43_p1  ;;  %s193_s13 = sshll.u32 %s770_s12, 4  ;;  %s194_s13 = int_to_ptr.vmem [resolvable:$true] %s193_s13 }
  0x11   : > { %s29_s15 = sadd.s32 1, %s761_s20  ;;  %s26_s16 = ssub.s32 %s765_s21, %s864_s14 }
  0x12   : > { %547 = dma.hbm_to_vmem [thread:$0]  (!%p545_p10), %s175_s28, 2048, %s177_s6, [#allocation6], %s971_s10, %s971_s10, %s769_s11  }
  0x13   : > { %550 = dma.hbm_to_vmem [thread:$0]  (!%p545_p10), %s192_s9, 2048, %s194_s13, [#allocation6], %s971_s10, %s971_s10, %s769_s11  }
  0x14   : > { %p36_p11 = scmp.ne.s32.totalorder %s761_s20, %s757_s19  ;;  %p27_p12 = scmp.eq.s32.totalorder %s26_s16, 0 }
  0x15   : > { %p37_p13 = scmp.eq.s32.totalorder %s765_s21, 0  ;;  %p561_p3 = scmp.lt.s32.totalorder %s765_s21, 4 }
  0x16   : > { %p874_p0 = por %p150_p2, %p36_p11  ;;  %s210_s26 = sand.u32 1, %s761_s20  }
  0x17   : > { %s880_s23 = scalar_select %p27_p12, %s761_s20, %s29_s15  }
  0x18   : > { %p38_p5 = por %p37_p13, %p36_p11  ;;  %s485_s27 = sshll.u32 %s210_s26, 4 }
  0x19   : > { %s498_s28 = sshll.u32 %s765_s21, 4  ;;  %s214_s8 = scalar_lea.vmem [#allocation2], %s485_s27 }
  0x1a   : > { %s219_s7 = scalar_lea.hbm %s965_s0, %s498_s28  ;;  %s222_s9 = sshll.u32 %s214_s8, 4  ;;  %s223_s9 = int_to_ptr.vmem [resolvable:$true] %s222_s9 }
  0x1b   : > { %s220_s12 = sshll.u32 %s219_s7, 4  ;;  %p887_p2 = pnand %p561_p3, %p38_p5  ;;  %s221_s12 = int_to_ptr.hbm [resolvable:$true] %s220_s12 }
  0x1c   : > { %s211_s15 = scalar_lea.sflag [#allocation3], %s210_s26  ;;  %s665_s16 = sshra.s32 %s221_s12, 4  ;;  %s666_s16 = int_to_ptr.hbm [resolvable:$true] %s665_s16 }
  0x1d   : > { %s667_s10 = scalar_lea.hbm %s666_s16, 16  ;;  %p669_p9 = pneg %p887_p2 }
  0x1e   : > { %p668_p7 = scmp.ne.s32.totalorder %s666_s16, %s667_s10  ;;  %s672_s30 = scalar_lea.hbm %s965_s0, 64 }
  0x1f   : > { %p673_p12 = scmp.lt.s32.totalorder %s666_s16, %s965_s0  ;;  %p674_p13 = scmp.lt.s32.totalorder %s672_s30, %s667_s10 }
  0x20   : > { %p670_p10 = pnand %p669_p9, %p668_p7 }
  0x21   : > { %p675_p3 = por %p674_p13, %p673_p12 }
  0x22   : > { %p671_p11 = pneg %p670_p10 }
  0x24   : > { %p676_p5 = pnand %p675_p3, %p671_p11 }
  0x26   : > { %679 = shalt.err (!%p676_p5)
}
  0x27   : > { %s977_s26 = smov 128   ;;  %234 = sbr.rel (%p846_p8) target bundleno = 353 (0x161), region = 40 }
  0x28   : > { %554 = dma.hbm_to_vmem [thread:$0]  (!%p887_p2), %s221_s12, 256, %s223_s9, %s211_s15, %s977_s26, %s977_s26, %s769_s11  }
  0x29   : > { %s907_s8 = sand.u32 (!%p846_p8), 1, %s757_s19  }
  0x2a   : > { %s489_s10 = sshll.u32 (!%p846_p8), %s907_s8, 4  ;;  %s237_s16 = scalar_lea.sflag (!%p846_p8), [#allocation3], %s907_s8 }
  0x2b   : > { %s913_s28 = scalar_lea.vmem (!%p846_p8), [#allocation2], %s489_s10 }
  0x2c   : > { %740 = dma.done.wait (%p833_p4), %s237_s16, 256  }
  0x2d   : > { %742 = vsyncadd (%p833_p4), %s237_s16, 4294967040 }
  0x2e   : > { %744 = dma.done.wait (%p43_p1), [#allocation6], 4096  }
  0x2f   : > { %746 = vsyncadd (%p43_p1), [#allocation6], 4294963200  ;;  %v297_v0 = vld [vmem:[#allocation5 + $0x78] sm:$0xff]  ;;  %v296_v1 = vld [vmem:[#allocation5 + $0x70] sm:$0xff]  ;;  %s277_s12 = scalar_lea.vmem [#allocation8], %s489_s10  ;;  %s499_s13 = sshll.u32 %s824_s22, 4 }
  0x30   : > { %500 = vmatpush.msra.mxu2 %v297_v0  ;;  %302 = vmatpush.msra.mxu0 %v297_v0  ;;  %v295_v2 = vld [vmem:[#allocation5 + $0x68] sm:$0xff]  ;;  %v294_v3 = vld [vmem:[#allocation5 + $0x60] sm:$0xff]  ;;  %v293_v4 = vld [vmem:[#allocation5 + $0x58] sm:$0xff]  ;;  %s384_s30 = scalar_lea.hbm %s970_s5, %s499_s13  ;;  %s385_s6 = sshll.u32 %s277_s12, 4  ;;  %s386_s6 = int_to_ptr.vmem [resolvable:$true] %s385_s6 }
  0x31   : > { %v342_v5 = vld [vmem:[#allocation7 + $0x78] sm:$0xff]  ;;  %v341_v6 = vld [vmem:[#allocation7 + $0x70] sm:$0xff]  ;;  %v340_v8 = vld [vmem:[#allocation7 + $0x68] sm:$0xff]  ;;  %s387_s7 = sshll.u32 %s384_s30, 4  ;;  %s373_s26 = scalar_lea.sflag [#allocation4], %s907_s8  ;;  %s388_s7 = int_to_ptr.hbm [resolvable:$true] %s387_s7 }
  0x32   : > { %501 = vmatpush.msra.mxu2 %v296_v1  ;;  %303 = vmatpush.msra.mxu0 %v296_v1  ;;  %v292_v7 = vld [vmem:[#allocation5 + $0x50] sm:$0xff]  ;;  %v291_v9 = vld [vmem:[#allocation5 + $0x48] sm:$0xff]  ;;  %v339_v10 = vld [vmem:[#allocation7 + $0x60] sm:$0xff]  ;;  %s709_s16 = sshra.s32 %s388_s7, 4  ;;  %s715_s24 = scalar_lea.hbm %s970_s5, 64  ;;  %s710_s16 = int_to_ptr.hbm [resolvable:$true] %s709_s16 }
  0x33   : > { %516 = vmatpush.msra.mxu3 %v342_v5  ;;  %347 = vmatpush.msra.mxu1 %v342_v5  ;;  %v290_v11 = vld [vmem:[#allocation5 + $0x40] sm:$0xff]  ;;  %v338_v12 = vld [vmem:[#allocation7 + $0x58] sm:$0xff]  ;;  %v337_v14 = vld [vmem:[#allocation7 + $0x50] sm:$0xff]  ;;  %p716_p2 = scmp.lt.s32.totalorder %s710_s16, %s970_s5 }
  0x34   : > { %502 = vmatpush.msra.mxu2 %v295_v2  ;;  %304 = vmatpush.msra.mxu0 %v295_v2  ;;  %v289_v13 = vld [vmem:[#allocation5 + $0x38] sm:$0xff]  ;;  %v288_v15 = vld [vmem:[#allocation5 + $0x30] sm:$0xff]  ;;  %v336_v16 = vld [vmem:[#allocation7 + $0x48] sm:$0xff] }
  0x35   : > { %517 = vmatpush.msra.mxu3 %v341_v6  ;;  %348 = vmatpush.msra.mxu1 %v341_v6  ;;  %v287_v17 = vld [vmem:[#allocation5 + $0x28] sm:$0xff]  ;;  %v335_v18 = vld [vmem:[#allocation7 + $0x40] sm:$0xff]  ;;  %v334_v20 = vld [vmem:[#allocation7 + $0x38] sm:$0xff] }
  0x36   : > { %503 = vmatpush.msra.mxu2 %v294_v3  ;;  %305 = vmatpush.msra.mxu0 %v294_v3  ;;  %v286_v19 = vld [vmem:[#allocation5 + $0x20] sm:$0xff]  ;;  %v285_v21 = vld [vmem:[#allocation5 + $0x18] sm:$0xff]  ;;  %v333_v22 = vld [vmem:[#allocation7 + $0x30] sm:$0xff] }
  0x37   : > { %518 = vmatpush.msra.mxu3 %v340_v8  ;;  %349 = vmatpush.msra.mxu1 %v340_v8  ;;  %v284_v23 = vld [vmem:[#allocation5 + $0x10] sm:$0xff]  ;;  %v332_v24 = vld [vmem:[#allocation7 + $0x28] sm:$0xff]  ;;  %v331_v26 = vld [vmem:[#allocation7 + $0x20] sm:$0xff] }
  0x38   : > { %504 = vmatpush.msra.mxu2 %v293_v4  ;;  %306 = vmatpush.msra.mxu0 %v293_v4  ;;  %v283_v25 = vld [vmem:[#allocation5 + $0x8] sm:$0xff]  ;;  %v282_v27 = vld [vmem:[#allocation5] sm:$0xff]  ;;  %v330_v30 = vld [vmem:[#allocation7 + $0x18] sm:$0xff] }
  0x39   : > { %519 = vmatpush.msra.mxu3 %v339_v10  ;;  %350 = vmatpush.msra.mxu1 %v339_v10  ;;  %v281_v28 = vld [vmem:[%s913_s28 + $0x8] sm:$0xff]  ;;  %v280_v29 = vld [vmem:[%s913_s28] sm:$0xff]  ;;  %s711_s28 = scalar_lea.hbm %s710_s16, 16 }
  0x3a   : > { %505 = vmatpush.msra.mxu2 %v292_v7  ;;  %307 = vmatpush.msra.mxu0 %v292_v7  ;;  %v329_v31 = vld [vmem:[#allocation7 + $0x10] sm:$0xff]  ;;  %v328_v32 = vld [vmem:[#allocation7 + $0x8] sm:$0xff]  ;;  %v327_v33 = vld [vmem:[#allocation7] sm:$0xff]  ;;  %p712_p1 = scmp.ne.s32.totalorder %s710_s16, %s711_s28  ;;  %p717_p7 = scmp.lt.s32.totalorder %s715_s24, %s711_s28 }
  0x3b   : > { %520 = vmatpush.msra.mxu3 %v338_v12  ;;  %351 = vmatpush.msra.mxu1 %v338_v12  ;;  %v603_v34 = vld [vmem:[%s967_s2] ss:$0 sm:$0xff] }
  0x3c   : > { %506 = vmatpush.msra.mxu2 %v291_v9  ;;  %308 = vmatpush.msra.mxu0 %v291_v9  ;;  %v604_v41 = vld [vmem:[%s969_s4] ss:$0 sm:$0xff]  ;;  %p713_p4 = pnand %p712_p1, %p874_p0  ;;  %p718_p9 = por %p717_p7, %p716_p2 }
  0x3d   : > { %521 = vmatpush.msra.mxu3 %v337_v14  ;;  %352 = vmatpush.msra.mxu1 %v337_v14 }
  0x3e   : > { %507 = vmatpush.msra.mxu2 %v290_v11  ;;  %309 = vmatpush.msra.mxu0 %v290_v11  ;;  %p714_p8 = pneg %p713_p4 }
  0x3f   : > { %522 = vmatpush.msra.mxu3 %v336_v16  ;;  %353 = vmatpush.msra.mxu1 %v336_v16 }
  0x40   : > { %508 = vmatpush.msra.mxu2 %v289_v13  ;;  %310 = vmatpush.msra.mxu0 %v289_v13  ;;  %p719_p10 = pnand %p718_p9, %p714_p8 }
  0x41   : > { %523 = vmatpush.msra.mxu3 %v335_v18  ;;  %354 = vmatpush.msra.mxu1 %v335_v18 }
  0x42   : > { %509 = vmatpush.msra.mxu2 %v288_v15  ;;  %311 = vmatpush.msra.mxu0 %v288_v15 }
  0x43   : > { %524 = vmatpush.msra.mxu3 %v334_v20  ;;  %355 = vmatpush.msra.mxu1 %v334_v20 }
  0x44   : > { %510 = vmatpush.msra.mxu2 %v287_v17  ;;  %312 = vmatpush.msra.mxu0 %v287_v17 }
  0x45   : > { %525 = vmatpush.msra.mxu3 %v333_v22  ;;  %356 = vmatpush.msra.mxu1 %v333_v22 }
  0x46   : > { %511 = vmatpush.msra.mxu2 %v286_v19  ;;  %313 = vmatpush.msra.mxu0 %v286_v19 }
  0x47   : > { %526 = vmatpush.msra.mxu3 %v332_v24  ;;  %357 = vmatpush.msra.mxu1 %v332_v24 }
  0x48   : > { %512 = vmatpush.msra.mxu2 %v285_v21  ;;  %314 = vmatpush.msra.mxu0 %v285_v21 }
  0x49   : > { %527 = vmatpush.msra.mxu3 %v331_v26  ;;  %358 = vmatpush.msra.mxu1 %v331_v26 }
  0x4a   : > { %513 = vmatpush.msra.mxu2 %v284_v23  ;;  %315 = vmatpush.msra.mxu0 %v284_v23 }
  0x4b   : > { %528 = vmatpush.msra.mxu3 %v330_v30  ;;  %359 = vmatpush.msra.mxu1 %v330_v30 }
  0x4c   : > { %514 = vmatpush.msra.mxu2 %v283_v25  ;;  %316 = vmatpush.msra.mxu0 %v283_v25 }
  0x4d   : > { %529 = vmatpush.msra.mxu3 %v329_v31  ;;  %360 = vmatpush.msra.mxu1 %v329_v31 }
  0x4e   : > { %515 = vmatpush.msra.mxu2 %v282_v27  ;;  %317 = vmatpush.msra.mxu0 %v282_v27 }
  0x4f   : > { %321 = vmatmul.f32.vlgmr.msra.gmra.mxu2 %v281_v28  ;;  %318 = vmatmul.f32.vlgmr.msra.gmra.mxu0 %v280_v29 }
  0x50   : > { %530 = vmatpush.msra.mxu3 %v328_v32  ;;  %361 = vmatpush.msra.mxu1 %v328_v32 }
  0x52   : > { %531 = vmatpush.msra.mxu3 %v327_v33  ;;  %362 = vmatpush.msra.mxu1 %v327_v33 }
  0xcc   : > { %v319_v35 = vpop.f32.mrf.mxu0 }
  0xcd   : > { %v320_v36 = vadd.f32 %v603_v34, %v319_v35 }
  0xcf   : > { %v325_v37 = vmax.f32 %v320_v36, 0.0 }
  0xd1   : > { %363 = vmatmul.f32.vlgmr.msra.gmra.mxu1 %v325_v37 }
  0xd2   : > { %v322_v38 = vpop.f32.mrf.mxu2 }
  0xd3   : > { %v323_v39 = vadd.f32 %v603_v34, %v322_v38 }
  0xd5   : > { %v326_v40 = vmax.f32 %v323_v39, 0.0 }
  0xd7   : > { %366 = vmatmul.f32.vlgmr.msra.gmra.mxu3 %v326_v40 }
 0x14e   : > { %v364_v42 = vpop.f32.mrf.mxu1 }
 0x14f   : > { %v365_v43 = vadd.f32 %v604_v41, %v364_v42 }
 0x151   : > { %370 = vst [vmem:[%s277_s12] sm:$0xff] %v365_v43 }
 0x15a   : > { %v367_v44 = vpop.f32.mrf.mxu3 }
 0x15b   : > { %v368_v45 = vadd.f32 %v604_v41, %v367_v44 }
 0x15d   : > { %371 = vst [vmem:[%s277_s12 + $0x8] sm:$0xff] %v368_v45 }
 0x15e   : > { %722 = shalt.err (!%p719_p10)
}
 0x15f   : > { %s771_s8 = smov 128   ;;  %s772_s9 = smov 8  }
 0x160   : > { %542 = dma.vmem_to_hbm [thread:$0]  (%p874_p0), %s386_s6, 256, %s388_s7, %s373_s26, %s771_s8, %s771_s8, %s772_s9  }
 0x161 PF: > { %p564_p11 = scmp.ge.s32.totalorder %s765_s21, 2  ;;  %s402_s12 = sand.u32 1, %s753_s18  }
 0x162   : > { %s403_s13 = scalar_lea.sflag [#allocation4], %s402_s12 }
 0x163   : > { %p556_p12 = pnand %p564_p11, %p838_p6 }
 0x165   : > { %p557_p13 = pneg %p556_p12 }
 0x167   : > { %748 = dma.done.wait (%p557_p13), %s403_s13, 256  }
 0x168   : > { %750 = vsyncadd (%p557_p13), %s403_s13, 4294967040  ;;  %p19_p3 = scmp.ge.s32.totalorder %s864_s14, 6   ;;  %s978_s18 = smov %s757_s19 }
 0x169   : > { %s979_s19 = smov %s761_s20  ;;  %s980_s20 = smov %s880_s23 }
 0x16a   : > { %s981_s21 = smov %s864_s14  ;;  %21 = sbr.rel (!%p19_p3) target bundleno = 6 (0x6), region = 93 }
 0x16f   :  { %409 = vsyncpa [#allocation3], 1 }
 0x170   :  { %411 = vsyncpa [#allocation3 + $0x1], 1 }
 0x171   :  { %412 = vsyncpa [#allocation6], 1 }
 0x172   :  { %413 = vsyncpa [#allocation4], 1 }
 0x173   :  { %415 = vsyncpa [#allocation4 + $0x1], 1 }

// kernel: tpu_custom_call.1
= control target key start
LH: loop header
LB: loop body
LE: loop exit
PB: predicated region body
PF: predicated region fallthrough
CT: control target
= control target key end

     0   :  { %10 = vsyncpa [#allocation3], 0  ;;  %s965_s0 = inlined_call_operand.hbm [shape: f32[64,128], index: 0, kind: input, shape index: {}]   ;;  %s966_s1 = inlined_call_operand.hbm [shape: f32[128,128], index: 1, kind: input, shape index: {}]   ;;  %s967_s2 = inlined_call_operand.vmem [shape: f32[1,128], index: 2, kind: input, shape index: {}]   ;;  %s968_s3 = inlined_call_operand.hbm [shape: f32[128,128], index: 3, kind: input, shape index: {}]   ;;  %s969_s4 = inlined_call_operand.vmem [shape: f32[1,128], index: 4, kind: input, shape index: {}]   ;;  %s970_s5 = inlined_call_operand.hbm [shape: f32[64,128], index: 5, kind: output, shape index: {}]  }
   0x1   :  { %12 = vsyncpa [#allocation3 + $0x1], 0 }
   0x2   :  { %13 = vsyncpa [#allocation6], 0 }
   0x3   :  { %14 = vsyncpa [#allocation4], 0 }
   0x4   :  { %16 = vsyncpa [#allocation4 + $0x1], 0  ;;  %s803_s18 = smov 0   ;;  %s805_s19 = smov 0  }
   0x5   :  { %s807_s20 = smov 0   ;;  %s809_s21 = smov 0  }
   0x6 LB: > { %s824_s22 = sadd.s32 4294967295, %s765_s21   ;;  %s480_s23 = sadd.s32 4294967294, %s765_s21   ;;  %s765_s21 = sphi %s809_s21, %s981_s21   ;;  %s761_s20 = sphi %s807_s20, %s980_s20   ;;  %s757_s19 = sphi %s805_s19, %s979_s19   ;;  %s753_s18 = sphi %s803_s18, %s978_s18  }
   0x7   : > { %p42_p0 = scmp.ne.s32.totalorder %s757_s19, %s753_s18  ;;  %p43_p1 = scmp.eq.s32.totalorder %s824_s22, 0 }
   0x8   : > { %p150_p2 = scmp.eq.s32.totalorder %s824_s22, 3  ;;  %p156_p3 = scmp.eq.s32.totalorder %s480_s23, 3 }
   0x9   : > { %p833_p4 = por %p43_p1, %p42_p0  ;;  %p481_p5 = scmp.ge.s32.totalorder %s765_s21, 1 }
   0xa   : > { %p838_p6 = por %p156_p3, %p42_p0  ;;  %p163_p7 = scmp.lt.s32.totalorder %s765_s21, 5 }
   0xb   : > { %s174_s28 = sshll.u32 %s966_s1, 4  ;;  %s767_s30 = smov [#allocation5]   ;;  %s175_s28 = int_to_ptr.hbm [resolvable:$true] %s174_s28 }
   0xc   : > { %p846_p8 = pnand %p481_p5, %p163_p7  ;;  %s176_s6 = sshll.u32 %s767_s30, 4  ;;  %s177_s6 = int_to_ptr.vmem [resolvable:$true] %s176_s6 }
   0xd   : > { %s191_s9 = sshll.u32 %s968_s3, 4  ;;  %s971_s10 = smov 128   ;;  %s192_s9 = int_to_ptr.hbm [resolvable:$true] %s191_s9 }
   0xe   : > { %p544_p9 = pneg %p846_p8  ;;  %s769_s11 = smov 8  }
   0xf   : > { %s770_s12 = smov [#allocation7]   ;;  %s864_s14 = sadd.s32 1, %s765_s21  }
  0x10   : > { %p545_p10 = pnand %p544_p9, %p43_p1  ;;  %s193_s13 = sshll.u32 %s770_s12, 4  ;;  %s194_s13 = int_to_ptr.vmem [resolvable:$true] %s193_s13 }
  0x11   : > { %s29_s15 = sadd.s32 1, %s761_s20  ;;  %s26_s16 = ssub.s32 %s765_s21, %s864_s14 }
  0x12   : > { %547 = dma.hbm_to_vmem [thread:$0]  (!%p545_p10), %s175_s28, 2048, %s177_s6, [#allocation6], %s971_s10, %s971_s10, %s769_s11  }
  0x13   : > { %550 = dma.hbm_to_vmem [thread:$0]  (!%p545_p10), %s192_s9, 2048, %s194_s13, [#allocation6], %s971_s10, %s971_s10, %s769_s11  }
  0x14   : > { %p36_p11 = scmp.ne.s32.totalorder %s761_s20, %s757_s19  ;;  %p27_p12 = scmp.eq.s32.totalorder %s26_s16, 0 }
  0x15   : > { %p37_p13 = scmp.eq.s32.totalorder %s765_s21, 0  ;;  %p561_p3 = scmp.lt.s32.totalorder %s765_s21, 4 }
  0x16   : > { %p874_p0 = por %p150_p2, %p36_p11  ;;  %s210_s26 = sand.u32 1, %s761_s20  }
  0x17   : > { %s880_s23 = scalar_select %p27_p12, %s761_s20, %s29_s15  }
  0x18   : > { %p38_p5 = por %p37_p13, %p36_p11  ;;  %s485_s27 = sshll.u32 %s210_s26, 4 }
  0x19   : > { %s498_s28 = sshll.u32 %s765_s21, 4  ;;  %s214_s8 = scalar_lea.vmem [#allocation2], %s485_s27 }
  0x1a   : > { %s219_s7 = scalar_lea.hbm %s965_s0, %s498_s28  ;;  %s222_s9 = sshll.u32 %s214_s8, 4  ;;  %s223_s9 = int_to_ptr.vmem [resolvable:$true] %s222_s9 }
  0x1b   : > { %s220_s12 = sshll.u32 %s219_s7, 4  ;;  %p887_p2 = pnand %p561_p3, %p38_p5  ;;  %s221_s12 = int_to_ptr.hbm [resolvable:$true] %s220_s12 }
  0x1c   : > { %s211_s15 = scalar_lea.sflag [#allocation3], %s210_s26  ;;  %s665_s16 = sshra.s32 %s221_s12, 4  ;;  %s666_s16 = int_to_ptr.hbm [resolvable:$true] %s665_s16 }
  0x1d   : > { %s667_s10 = scalar_lea.hbm %s666_s16, 16  ;;  %p669_p9 = pneg %p887_p2 }
  0x1e   : > { %p668_p7 = scmp.ne.s32.totalorder %s666_s16, %s667_s10  ;;  %s672_s30 = scalar_lea.hbm %s965_s0, 64 }
  0x1f   : > { %p673_p12 = scmp.lt.s32.totalorder %s666_s16, %s965_s0  ;;  %p674_p13 = scmp.lt.s32.totalorder %s672_s30, %s667_s10 }
  0x20   : > { %p670_p10 = pnand %p669_p9, %p668_p7 }
  0x21   : > { %p675_p3 = por %p674_p13, %p673_p12 }
  0x22   : > { %p671_p11 = pneg %p670_p10 }
  0x24   : > { %p676_p5 = pnand %p675_p3, %p671_p11 }
  0x26   : > { %679 = shalt.err (!%p676_p5)
}
  0x27   : > { %s977_s26 = smov 128   ;;  %234 = sbr.rel (%p846_p8) target bundleno = 353 (0x161), region = 40 }
  0x28   : > { %554 = dma.hbm_to_vmem [thread:$0]  (!%p887_p2), %s221_s12, 256, %s223_s9, %s211_s15, %s977_s26, %s977_s26, %s769_s11  }
  0x29   : > { %s907_s8 = sand.u32 (!%p846_p8), 1, %s757_s19  }
  0x2a   : > { %s489_s10 = sshll.u32 (!%p846_p8), %s907_s8, 4  ;;  %s237_s16 = scalar_lea.sflag (!%p846_p8), [#allocation3], %s907_s8 }
  0x2b   : > { %s913_s28 = scalar_lea.vmem (!%p846_p8), [#allocation2], %s489_s10 }
  0x2c   : > { %740 = dma.done.wait (%p833_p4), %s237_s16, 256  }
  0x2d   : > { %742 = vsyncadd (%p833_p4), %s237_s16, 4294967040 }
  0x2e   : > { %744 = dma.done.wait (%p43_p1), [#allocation6], 4096  }
  0x2f   : > { %746 = vsyncadd (%p43_p1), [#allocation6], 4294963200  ;;  %v297_v0 = vld [vmem:[#allocation5 + $0x78] sm:$0xff]  ;;  %v296_v1 = vld [vmem:[#allocation5 + $0x70] sm:$0xff]  ;;  %s277_s12 = scalar_lea.vmem [#allocation8], %s489_s10  ;;  %s499_s13 = sshll.u32 %s824_s22, 4 }
  0x30   : > { %500 = vmatpush.msra.mxu2 %v297_v0  ;;  %302 = vmatpush.msra.mxu0 %v297_v0  ;;  %v295_v2 = vld [vmem:[#allocation5 + $0x68] sm:$0xff]  ;;  %v294_v3 = vld [vmem:[#allocation5 + $0x60] sm:$0xff]  ;;  %v293_v4 = vld [vmem:[#allocation5 + $0x58] sm:$0xff]  ;;  %s384_s30 = scalar_lea.hbm %s970_s5, %s499_s13  ;;  %s385_s6 = sshll.u32 %s277_s12, 4  ;;  %s386_s6 = int_to_ptr.vmem [resolvable:$true] %s385_s6 }
  0x31   : > { %v342_v5 = vld [vmem:[#allocation7 + $0x78] sm:$0xff]  ;;  %v341_v6 = vld [vmem:[#allocation7 + $0x70] sm:$0xff]  ;;  %v340_v8 = vld [vmem:[#allocation7 + $0x68] sm:$0xff]  ;;  %s387_s7 = sshll.u32 %s384_s30, 4  ;;  %s373_s26 = scalar_lea.sflag [#allocation4], %s907_s8  ;;  %s388_s7 = int_to_ptr.hbm [resolvable:$true] %s387_s7 }
  0x32   : > { %501 = vmatpush.msra.mxu2 %v296_v1  ;;  %303 = vmatpush.msra.mxu0 %v296_v1  ;;  %v292_v7 = vld [vmem:[#allocation5 + $0x50] sm:$0xff]  ;;  %v291_v9 = vld [vmem:[#allocation5 + $0x48] sm:$0xff]  ;;  %v339_v10 = vld [vmem:[#allocation7 + $0x60] sm:$0xff]  ;;  %s709_s16 = sshra.s32 %s388_s7, 4  ;;  %s715_s24 = scalar_lea.hbm %s970_s5, 64  ;;  %s710_s16 = int_to_ptr.hbm [resolvable:$true] %s709_s16 }
  0x33   : > { %516 = vmatpush.msra.mxu3 %v342_v5  ;;  %347 = vmatpush.msra.mxu1 %v342_v5  ;;  %v290_v11 = vld [vmem:[#allocation5 + $0x40] sm:$0xff]  ;;  %v338_v12 = vld [vmem:[#allocation7 + $0x58] sm:$0xff]  ;;  %v337_v14 = vld [vmem:[#allocation7 + $0x50] sm:$0xff]  ;;  %p716_p2 = scmp.lt.s32.totalorder %s710_s16, %s970_s5 }
  0x34   : > { %502 = vmatpush.msra.mxu2 %v295_v2  ;;  %304 = vmatpush.msra.mxu0 %v295_v2  ;;  %v289_v13 = vld [vmem:[#allocation5 + $0x38] sm:$0xff]  ;;  %v288_v15 = vld [vmem:[#allocation5 + $0x30] sm:$0xff]  ;;  %v336_v16 = vld [vmem:[#allocation7 + $0x48] sm:$0xff] }
  0x35   : > { %517 = vmatpush.msra.mxu3 %v341_v6  ;;  %348 = vmatpush.msra.mxu1 %v341_v6  ;;  %v287_v17 = vld [vmem:[#allocation5 + $0x28] sm:$0xff]  ;;  %v335_v18 = vld [vmem:[#allocation7 + $0x40] sm:$0xff]  ;;  %v334_v20 = vld [vmem:[#allocation7 + $0x38] sm:$0xff] }
  0x36   : > { %503 = vmatpush.msra.mxu2 %v294_v3  ;;  %305 = vmatpush.msra.mxu0 %v294_v3  ;;  %v286_v19 = vld [vmem:[#allocation5 + $0x20] sm:$0xff]  ;;  %v285_v21 = vld [vmem:[#allocation5 + $0x18] sm:$0xff]  ;;  %v333_v22 = vld [vmem:[#allocation7 + $0x30] sm:$0xff] }
  0x37   : > { %518 = vmatpush.msra.mxu3 %v340_v8  ;;  %349 = vmatpush.msra.mxu1 %v340_v8  ;;  %v284_v23 = vld [vmem:[#allocation5 + $0x10] sm:$0xff]  ;;  %v332_v24 = vld [vmem:[#allocation7 + $0x28] sm:$0xff]  ;;  %v331_v26 = vld [vmem:[#allocation7 + $0x20] sm:$0xff] }
  0x38   : > { %504 = vmatpush.msra.mxu2 %v293_v4  ;;  %306 = vmatpush.msra.mxu0 %v293_v4  ;;  %v283_v25 = vld [vmem:[#allocation5 + $0x8] sm:$0xff]  ;;  %v282_v27 = vld [vmem:[#allocation5] sm:$0xff]  ;;  %v330_v30 = vld [vmem:[#allocation7 + $0x18] sm:$0xff] }
  0x39   : > { %519 = vmatpush.msra.mxu3 %v339_v10  ;;  %350 = vmatpush.msra.mxu1 %v339_v10  ;;  %v281_v28 = vld [vmem:[%s913_s28 + $0x8] sm:$0xff]  ;;  %v280_v29 = vld [vmem:[%s913_s28] sm:$0xff]  ;;  %s711_s28 = scalar_lea.hbm %s710_s16, 16 }
  0x3a   : > { %505 = vmatpush.msra.mxu2 %v292_v7  ;;  %307 = vmatpush.msra.mxu0 %v292_v7  ;;  %v329_v31 = vld [vmem:[#allocation7 + $0x10] sm:$0xff]  ;;  %v328_v32 = vld [vmem:[#allocation7 + $0x8] sm:$0xff]  ;;  %v327_v33 = vld [vmem:[#allocation7] sm:$0xff]  ;;  %p712_p1 = scmp.ne.s32.totalorder %s710_s16, %s711_s28  ;;  %p717_p7 = scmp.lt.s32.totalorder %s715_s24, %s711_s28 }
  0x3b   : > { %520 = vmatpush.msra.mxu3 %v338_v12  ;;  %351 = vmatpush.msra.mxu1 %v338_v12  ;;  %v603_v34 = vld [vmem:[%s967_s2] ss:$0 sm:$0xff] }
  0x3c   : > { %506 = vmatpush.msra.mxu2 %v291_v9  ;;  %308 = vmatpush.msra.mxu0 %v291_v9  ;;  %v604_v41 = vld [vmem:[%s969_s4] ss:$0 sm:$0xff]  ;;  %p713_p4 = pnand %p712_p1, %p874_p0  ;;  %p718_p9 = por %p717_p7, %p716_p2 }
  0x3d   : > { %521 = vmatpush.msra.mxu3 %v337_v14  ;;  %352 = vmatpush.msra.mxu1 %v337_v14 }
  0x3e   : > { %507 = vmatpush.msra.mxu2 %v290_v11  ;;  %309 = vmatpush.msra.mxu0 %v290_v11  ;;  %p714_p8 = pneg %p713_p4 }
  0x3f   : > { %522 = vmatpush.msra.mxu3 %v336_v16  ;;  %353 = vmatpush.msra.mxu1 %v336_v16 }
  0x40   : > { %508 = vmatpush.msra.mxu2 %v289_v13  ;;  %310 = vmatpush.msra.mxu0 %v289_v13  ;;  %p719_p10 = pnand %p718_p9, %p714_p8 }
  0x41   : > { %523 = vmatpush.msra.mxu3 %v335_v18  ;;  %354 = vmatpush.msra.mxu1 %v335_v18 }
  0x42   : > { %509 = vmatpush.msra.mxu2 %v288_v15  ;;  %311 = vmatpush.msra.mxu0 %v288_v15 }
  0x43   : > { %524 = vmatpush.msra.mxu3 %v334_v20  ;;  %355 = vmatpush.msra.mxu1 %v334_v20 }
  0x44   : > { %510 = vmatpush.msra.mxu2 %v287_v17  ;;  %312 = vmatpush.msra.mxu0 %v287_v17 }
  0x45   : > { %525 = vmatpush.msra.mxu3 %v333_v22  ;;  %356 = vmatpush.msra.mxu1 %v333_v22 }
  0x46   : > { %511 = vmatpush.msra.mxu2 %v286_v19  ;;  %313 = vmatpush.msra.mxu0 %v286_v19 }
  0x47   : > { %526 = vmatpush.msra.mxu3 %v332_v24  ;;  %357 = vmatpush.msra.mxu1 %v332_v24 }
  0x48   : > { %512 = vmatpush.msra.mxu2 %v285_v21  ;;  %314 = vmatpush.msra.mxu0 %v285_v21 }
  0x49   : > { %527 = vmatpush.msra.mxu3 %v331_v26  ;;  %358 = vmatpush.msra.mxu1 %v331_v26 }
  0x4a   : > { %513 = vmatpush.msra.mxu2 %v284_v23  ;;  %315 = vmatpush.msra.mxu0 %v284_v23 }
  0x4b   : > { %528 = vmatpush.msra.mxu3 %v330_v30  ;;  %359 = vmatpush.msra.mxu1 %v330_v30 }
  0x4c   : > { %514 = vmatpush.msra.mxu2 %v283_v25  ;;  %316 = vmatpush.msra.mxu0 %v283_v25 }
  0x4d   : > { %529 = vmatpush.msra.mxu3 %v329_v31  ;;  %360 = vmatpush.msra.mxu1 %v329_v31 }
  0x4e   : > { %515 = vmatpush.msra.mxu2 %v282_v27  ;;  %317 = vmatpush.msra.mxu0 %v282_v27 }
  0x4f   : > { %321 = vmatmul.f32.vlgmr.msra.gmra.mxu2 %v281_v28  ;;  %318 = vmatmul.f32.vlgmr.msra.gmra.mxu0 %v280_v29 }
  0x50   : > { %530 = vmatpush.msra.mxu3 %v328_v32  ;;  %361 = vmatpush.msra.mxu1 %v328_v32 }
  0x52   : > { %531 = vmatpush.msra.mxu3 %v327_v33  ;;  %362 = vmatpush.msra.mxu1 %v327_v33 }
  0xcc   : > { %v319_v35 = vpop.f32.mrf.mxu0 }
  0xcd   : > { %v320_v36 = vadd.f32 %v603_v34, %v319_v35 }
  0xcf   : > { %v325_v37 = vmax.f32 %v320_v36, 0.0 }
  0xd1   : > { %363 = vmatmul.f32.vlgmr.msra.gmra.mxu1 %v325_v37 }
  0xd2   : > { %v322_v38 = vpop.f32.mrf.mxu2 }
  0xd3   : > { %v323_v39 = vadd.f32 %v603_v34, %v322_v38 }
  0xd5   : > { %v326_v40 = vmax.f32 %v323_v39, 0.0 }
  0xd7   : > { %366 = vmatmul.f32.vlgmr.msra.gmra.mxu3 %v326_v40 }
 0x14e   : > { %v364_v42 = vpop.f32.mrf.mxu1 }
 0x14f   : > { %v365_v43 = vadd.f32 %v604_v41, %v364_v42 }
 0x151   : > { %370 = vst [vmem:[%s277_s12] sm:$0xff] %v365_v43 }
 0x15a   : > { %v367_v44 = vpop.f32.mrf.mxu3 }
 0x15b   : > { %v368_v45 = vadd.f32 %v604_v41, %v367_v44 }
 0x15d   : > { %371 = vst [vmem:[%s277_s12 + $0x8] sm:$0xff] %v368_v45 }
 0x15e   : > { %722 = shalt.err (!%p719_p10)
}
 0x15f   : > { %s771_s8 = smov 128   ;;  %s772_s9 = smov 8  }
 0x160   : > { %542 = dma.vmem_to_hbm [thread:$0]  (%p874_p0), %s386_s6, 256, %s388_s7, %s373_s26, %s771_s8, %s771_s8, %s772_s9  }
 0x161 PF: > { %p564_p11 = scmp.ge.s32.totalorder %s765_s21, 2  ;;  %s402_s12 = sand.u32 1, %s753_s18  }
 0x162   : > { %s403_s13 = scalar_lea.sflag [#allocation4], %s402_s12 }
 0x163   : > { %p556_p12 = pnand %p564_p11, %p838_p6 }
 0x165   : > { %p557_p13 = pneg %p556_p12 }
 0x167   : > { %748 = dma.done.wait (%p557_p13), %s403_s13, 256  }
 0x168   : > { %750 = vsyncadd (%p557_p13), %s403_s13, 4294967040  ;;  %p19_p3 = scmp.ge.s32.totalorder %s864_s14, 6   ;;  %s978_s18 = smov %s757_s19 }
 0x169   : > { %s979_s19 = smov %s761_s20  ;;  %s980_s20 = smov %s880_s23 }
 0x16a   : > { %s981_s21 = smov %s864_s14  ;;  %21 = sbr.rel (!%p19_p3) target bundleno = 6 (0x6), region = 93 }
 0x16f   :  { %409 = vsyncpa [#allocation3], 1 }
 0x170   :  { %411 = vsyncpa [#allocation3 + $0x1], 1 }
 0x171   :  { %412 = vsyncpa [#allocation6], 1 }
 0x172   :  { %413 = vsyncpa [#allocation4], 1 }
 0x173   :  { %415 = vsyncpa [#allocation4 + $0x1], 1 }

</bundles_post_ra>
